<compile_context>
chip_gen: v7x
topology: tpu7x:2x2x1
jax: 0.10.0
libtpu: 0.0.40
codegen_flags: <defaults>
</compile_context>

<pallas_src>
import math

import jax
import jax.numpy as jnp
from jax.experimental import pallas as pl
from jax.experimental.pallas import tpu as pltpu


def _round_up(x, m):
    return ((x + m - 1) // m) * m


def _actor_kernel(ab_ref,            # (1,1) SMEM scalar: action_bound
                  state_ref,         # (TB, state_dim) f32
                  w1_ref, b1_ref,
                  w2_ref, b2_ref,
                  w3_ref, b3_ref,
                  wh_ref, bh_ref,    # fused mu|std head: (16, 2*A), (1, 2*A)
                  mu_ref,            # (TB, A)
                  std_ref):          # (TB, A)
    action_bound = ab_ref[0, 0]
    cd = w1_ref.dtype                # compute dtype comes from the weights

    # In-kernel cast (VPU) — free under the MXU cadence, avoids a wrapper pass.
    x = state_ref[...].astype(cd)

    # h1 + ReLU
    h = jnp.dot(x, w1_ref[...], preferred_element_type=jnp.float32) + b1_ref[...]
    h = jnp.maximum(h, 0.0)

    # h2 + ReLU
    h = jnp.dot(h.astype(cd), w2_ref[...],
                preferred_element_type=jnp.float32) + b2_ref[...]
    h = jnp.maximum(h, 0.0)

    # h3 + ReLU
    h = jnp.dot(h.astype(cd), w3_ref[...],
                preferred_element_type=jnp.float32) + b3_ref[...]
    h = jnp.maximum(h, 0.0)

    # Fused mu|std head: single MXU push, then per-half nonlinearities.
    y = jnp.dot(h.astype(cd), wh_ref[...],
                preferred_element_type=jnp.float32) + bh_ref[...]

    a = mu_ref.shape[1]
    mu_ref[...] = jnp.tanh(y[:, :a]) * action_bound
    std_ref[...] = jnp.logaddexp(y[:, a:], 0.0)   # numerically-stable softplus


def prepare_actor_params(params, compute_dtype=jnp.bfloat16):
    """One-time concat + cast of the weights (do this outside the rollout loop)."""
    cd = compute_dtype
    return {
        "w1": params["w1"].astype(cd), "b1": params["b1"].astype(jnp.float32),
        "w2": params["w2"].astype(cd), "b2": params["b2"].astype(jnp.float32),
        "w3": params["w3"].astype(cd), "b3": params["b3"].astype(jnp.float32),
        "wh": jnp.concatenate([params["wmu"], params["wstd"]], axis=1).astype(cd),
        "bh": jnp.concatenate([params["bmu"], params["bstd"]],
                              axis=1).astype(jnp.float32),
    }


def actor_forward(state, params, action_bound, *, block_batch=8192):
    """state: [B, state_dim] float32.
    params: output of prepare_actor_params (raw init params are auto-prepared).
    Returns [mu, std], each [B, action_dim] float32."""
    if "wh" not in params:                          # raw params -> prepare (bf16)
        params = prepare_actor_params(params)

    B, state_dim = state.shape
    action_dim = params["wh"].shape[1] // 2
    w_dtype = params["w1"].dtype

    # Batch tile rounding: 16 rows for 2-byte (bf16) weights, 8 for f32.
    row_mult = 16 if jnp.dtype(w_dtype).itemsize == 2 else 8
    tb = _round_up(min(block_batch, B), row_mult)
    # Guarantee grid >= 2 when there is enough work, so v7x's two TensorCores
    # both get a share (harmless on single-TC v5e/v6e).
    if _round_up(B, row_mult) >= 2 * row_mult:
        tb = min(tb, _round_up(B, 2 * row_mult) // 2)
    padded_B = _round_up(B, tb)
    if padded_B != B:
        state = jnp.pad(state, ((0, padded_B - B), (0, 0)))
    grid = (padded_B // tb,)

    ab = jnp.full((1, 1), action_bound, jnp.float32)

    def resident(arr):
        # Full-array block, constant index_map -> stays resident in VMEM.
        return pl.BlockSpec(arr.shape, lambda i: (0, 0),
                            memory_space=pltpu.MemorySpace.VMEM)

    w1, b1 = params["w1"], params["b1"]
    w2, b2 = params["w2"], params["b2"]
    w3, b3 = params["w3"], params["b3"]
    wh, bh = params["wh"], params["bh"]

    weight_bytes = sum(int(a.size) * a.dtype.itemsize
                       for a in (w1, b1, w2, b2, w3, b3, wh, bh))
    cost = pl.CostEstimate(
        flops=2 * padded_B * (state_dim * 64 + 64 * 32 + 32 * 16
                              + 16 * 2 * action_dim),
        transcendentals=3 * padded_B * action_dim,      # tanh + (exp, log)
        bytes_accessed=padded_B * (state_dim * 4 + 2 * action_dim * 4)
                       + weight_bytes,
    )

    mu, std = pl.pallas_call(
        _actor_kernel,
        out_shape=(jax.ShapeDtypeStruct((padded_B, action_dim), jnp.float32),
                   jax.ShapeDtypeStruct((padded_B, action_dim), jnp.float32)),
        grid=grid,
        in_specs=[
            pl.BlockSpec((1, 1), lambda i: (0, 0),
                         memory_space=pltpu.MemorySpace.SMEM),   # action_bound
            pl.BlockSpec((tb, state_dim), lambda i: (i, 0)),     # f32 state tile
            resident(w1), resident(b1),
            resident(w2), resident(b2),
            resident(w3), resident(b3),
            resident(wh), resident(bh),
        ],
        out_specs=[
            pl.BlockSpec((tb, action_dim), lambda i: (i, 0)),    # mu tile
            pl.BlockSpec((tb, action_dim), lambda i: (i, 0)),    # std tile
        ],
        compiler_params=pltpu.CompilerParams(
            dimension_semantics=("parallel",)),                  # v7x 2-TC shard
        cost_estimate=cost,
    )(ab, state, w1, b1, w2, b2, w3, b3, wh, bh)

    if padded_B != B:
        mu = mu[:B]
        std = std[:B]
    return [mu, std]


def init_actor_params(key, state_dim, action_dim):
    """Deterministic PyTorch-style (Kaiming-uniform-ish) init.

    Weights are stored as [in, out] (transposed relative to nn.Linear)."""
    dims = [(state_dim, 64), (64, 32), (32, 16), (16, action_dim), (16, action_dim)]
    names = [("w1", "b1"), ("w2", "b2"), ("w3", "b3"), ("wmu", "bmu"), ("wstd", "bstd")]
    params = {}
    for (fan_in, fan_out), (wn, bn) in zip(dims, names):
        key, kw, kb = jax.random.split(key, 3)
        bound = 1.0 / math.sqrt(fan_in)
        params[wn] = jax.random.uniform(
            kw, (fan_in, fan_out), jnp.float32, minval=-bound, maxval=bound)
        params[bn] = jax.random.uniform(
            kb, (1, fan_out), jnp.float32, minval=-bound, maxval=bound)
    return params


def actor_forward_ref(state, params, action_bound):
    """Pure-JAX reference for correctness checking (also the recommended path
    for tiny rollout batches B<=64 where kernel launch overhead dominates)."""
    x = jnp.maximum(state @ params["w1"] + params["b1"], 0.0)
    x = jnp.maximum(x @ params["w2"] + params["b2"], 0.0)
    x = jnp.maximum(x @ params["w3"] + params["b3"], 0.0)
    mu = jnp.tanh(x @ params["wmu"] + params["bmu"]) * action_bound
    std = jax.nn.softplus(x @ params["wstd"] + params["bstd"])
    return [mu, std]


if __name__ == "__main__":
    key = jax.random.PRNGKey(0)
    key, pkey, skey = jax.random.split(key, 3)

    batch = 64
    state_dim = 8
    action_dim = 4
    action_bound = 2.0

    params = init_actor_params(pkey, state_dim, action_dim)
    state = jax.random.normal(skey, (batch, state_dim), jnp.float32)

    mu_ref_v, std_ref_v = actor_forward_ref(state, params, action_bound)

    # f32 MXU path (tight numeric check). The two-TC clamp makes the grid 2
    # even at this small demo batch, exercising the batch pipeline.
    p_f32 = prepare_actor_params(params, jnp.float32)
    mu, std = actor_forward(state, p_f32, action_bound)
    jax.block_until_ready(mu)
    jax.block_until_ready(std)
    assert mu.shape == (batch, action_dim) and std.shape == (batch, action_dim)
    assert jnp.allclose(mu, mu_ref_v, atol=1e-5, rtol=1e-5)
    assert jnp.allclose(std, std_ref_v, atol=1e-5, rtol=1e-5)

    # bf16 production path (full-rate MXU on v6e/v7x); looser tolerance.
    p_bf16 = prepare_actor_params(params, jnp.bfloat16)
    mu_bf, std_bf = actor_forward(state, p_bf16, action_bound)
    jax.block_until_ready(mu_bf)
    jax.block_until_ready(std_bf)
    assert mu_bf.shape == (batch, action_dim) and std_bf.shape == (batch, action_dim)
    assert jnp.allclose(mu_bf, mu_ref_v, atol=5e-2, rtol=5e-2)
    assert jnp.allclose(std_bf, std_ref_v, atol=5e-2, rtol=5e-2)

    print("KERNEL_OK")
</pallas_src>

<mosaic_0001>
module attributes {stable_mosaic.version = 11 : i64} {
  func.func @_actor_kernel(%arg0: i32, %arg1: memref<1x1xf32, #tpu.memory_space<smem>>, %arg2: memref<32x8xf32, #tpu.memory_space<vmem>>, %arg3: memref<8x64xf32, #tpu.memory_space<vmem>>, %arg4: memref<1x64xf32, #tpu.memory_space<vmem>>, %arg5: memref<64x32xf32, #tpu.memory_space<vmem>>, %arg6: memref<1x32xf32, #tpu.memory_space<vmem>>, %arg7: memref<32x16xf32, #tpu.memory_space<vmem>>, %arg8: memref<1x16xf32, #tpu.memory_space<vmem>>, %arg9: memref<16x8xf32, #tpu.memory_space<vmem>>, %arg10: memref<1x8xf32, #tpu.memory_space<vmem>>, %arg11: memref<32x4xf32, #tpu.memory_space<vmem>>, %arg12: memref<32x4xf32, #tpu.memory_space<vmem>>) attributes {dimension_semantics = [#tpu.dimension_semantics<parallel>], iteration_bounds = array<i64: 2>, scalar_prefetch = 0 : i64, scratch_operands = 0 : i64, tpu.core_type = #tpu.core_type<tc>, window_params = [{transform_indices = @transform_0, window_bounds = array<i64: 1, 1>}, {transform_indices = @transform_1, window_bounds = array<i64: 32, 8>}, {pipeline_mode = #tpu.pipeline_mode<synchronous>, transform_indices = @transform_2, window_bounds = array<i64: 8, 64>}, {pipeline_mode = #tpu.pipeline_mode<synchronous>, transform_indices = @transform_3, window_bounds = array<i64: 1, 64>}, {pipeline_mode = #tpu.pipeline_mode<synchronous>, transform_indices = @transform_4, window_bounds = array<i64: 64, 32>}, {pipeline_mode = #tpu.pipeline_mode<synchronous>, transform_indices = @transform_5, window_bounds = array<i64: 1, 32>}, {pipeline_mode = #tpu.pipeline_mode<synchronous>, transform_indices = @transform_6, window_bounds = array<i64: 32, 16>}, {pipeline_mode = #tpu.pipeline_mode<synchronous>, transform_indices = @transform_7, window_bounds = array<i64: 1, 16>}, {pipeline_mode = #tpu.pipeline_mode<synchronous>, transform_indices = @transform_8, window_bounds = array<i64: 16, 8>}, {pipeline_mode = #tpu.pipeline_mode<synchronous>, transform_indices = @transform_9, window_bounds = array<i64: 1, 8>}, {transform_indices = @transform_10, window_bounds = array<i64: 32, 4>}, {transform_indices = @transform_11, window_bounds = array<i64: 32, 4>}]} {
    %c0 = arith.constant 0 : index
    %c0_0 = arith.constant 0 : index
    %0 = memref.load %arg1[%c0, %c0_0] : memref<1x1xf32, #tpu.memory_space<smem>>
    %c0_1 = arith.constant 0 : index
    %c0_2 = arith.constant 0 : index
    %1 = vector.load %arg2[%c0_1, %c0_2] : memref<32x8xf32, #tpu.memory_space<vmem>>, vector<32x8xf32>
    %c0_3 = arith.constant 0 : index
    %c0_4 = arith.constant 0 : index
    %2 = vector.load %arg3[%c0_3, %c0_4] : memref<8x64xf32, #tpu.memory_space<vmem>>, vector<8x64xf32>
    %cst = arith.constant dense<0.000000e+00> : vector<32x64xf32>
    %3 = tpu.matmul %1, %2, %cst {dimension_numbers = #tpu.dot_dimension_numbers<[1], [0], [0], [1], [0, 0, 1, 1], [], []>} : vector<32x8xf32>, vector<8x64xf32>, vector<32x64xf32> -> vector<32x64xf32>
    %c0_5 = arith.constant 0 : index
    %c0_6 = arith.constant 0 : index
    %4 = vector.load %arg4[%c0_5, %c0_6] : memref<1x64xf32, #tpu.memory_space<vmem>>, vector<1x64xf32>
    %5 = vector.broadcast %4 : vector<1x64xf32> to vector<32x64xf32>
    %6 = arith.addf %3, %5 : vector<32x64xf32>
    %cst_7 = arith.constant 0.000000e+00 : f32
    %7 = vector.broadcast %cst_7 : f32 to vector<32x64xf32>
    %8 = arith.maximumf %6, %7 : vector<32x64xf32>
    %c0_8 = arith.constant 0 : index
    %c0_9 = arith.constant 0 : index
    %9 = vector.load %arg5[%c0_8, %c0_9] : memref<64x32xf32, #tpu.memory_space<vmem>>, vector<64x32xf32>
    %cst_10 = arith.constant dense<0.000000e+00> : vector<32x32xf32>
    %10 = tpu.matmul %8, %9, %cst_10 {dimension_numbers = #tpu.dot_dimension_numbers<[1], [0], [0], [1], [0, 0, 1, 1], [], []>} : vector<32x64xf32>, vector<64x32xf32>, vector<32x32xf32> -> vector<32x32xf32>
    %c0_11 = arith.constant 0 : index
    %c0_12 = arith.constant 0 : index
    %11 = vector.load %arg6[%c0_11, %c0_12] : memref<1x32xf32, #tpu.memory_space<vmem>>, vector<1x32xf32>
    %12 = vector.broadcast %11 : vector<1x32xf32> to vector<32x32xf32>
    %13 = arith.addf %10, %12 : vector<32x32xf32>
    %cst_13 = arith.constant 0.000000e+00 : f32
    %14 = vector.broadcast %cst_13 : f32 to vector<32x32xf32>
    %15 = arith.maximumf %13, %14 : vector<32x32xf32>
    %c0_14 = arith.constant 0 : index
    %c0_15 = arith.constant 0 : index
    %16 = vector.load %arg7[%c0_14, %c0_15] : memref<32x16xf32, #tpu.memory_space<vmem>>, vector<32x16xf32>
    %cst_16 = arith.constant dense<0.000000e+00> : vector<32x16xf32>
    %17 = tpu.matmul %15, %16, %cst_16 {dimension_numbers = #tpu.dot_dimension_numbers<[1], [0], [0], [1], [0, 0, 1, 1], [], []>} : vector<32x32xf32>, vector<32x16xf32>, vector<32x16xf32> -> vector<32x16xf32>
    %c0_17 = arith.constant 0 : index
    %c0_18 = arith.constant 0 : index
    %18 = vector.load %arg8[%c0_17, %c0_18] : memref<1x16xf32, #tpu.memory_space<vmem>>, vector<1x16xf32>
    %19 = vector.broadcast %18 : vector<1x16xf32> to vector<32x16xf32>
    %20 = arith.addf %17, %19 : vector<32x16xf32>
    %cst_19 = arith.constant 0.000000e+00 : f32
    %21 = vector.broadcast %cst_19 : f32 to vector<32x16xf32>
    %22 = arith.maximumf %20, %21 : vector<32x16xf32>
    %c0_20 = arith.constant 0 : index
    %c0_21 = arith.constant 0 : index
    %23 = vector.load %arg9[%c0_20, %c0_21] : memref<16x8xf32, #tpu.memory_space<vmem>>, vector<16x8xf32>
    %cst_22 = arith.constant dense<0.000000e+00> : vector<32x8xf32>
    %24 = tpu.matmul %22, %23, %cst_22 {dimension_numbers = #tpu.dot_dimension_numbers<[1], [0], [0], [1], [0, 0, 1, 1], [], []>} : vector<32x16xf32>, vector<16x8xf32>, vector<32x8xf32> -> vector<32x8xf32>
    %c0_23 = arith.constant 0 : index
    %c0_24 = arith.constant 0 : index
    %25 = vector.load %arg10[%c0_23, %c0_24] : memref<1x8xf32, #tpu.memory_space<vmem>>, vector<1x8xf32>
    %26 = vector.broadcast %25 : vector<1x8xf32> to vector<32x8xf32>
    %27 = arith.addf %24, %26 : vector<32x8xf32>
    %28 = vector.extract_strided_slice %27 {offsets = [0, 0], sizes = [32, 4], strides = [1, 1]} : vector<32x8xf32> to vector<32x4xf32>
    %29 = math.tanh %28 : vector<32x4xf32>
    %30 = vector.broadcast %0 : f32 to vector<32x4xf32>
    %31 = arith.mulf %29, %30 : vector<32x4xf32>
    %c0_25 = arith.constant 0 : index
    %c0_26 = arith.constant 0 : index
    %32 = vector.load %arg11[%c0_25, %c0_26] : memref<32x4xf32, #tpu.memory_space<vmem>>, vector<32x4xf32>
    tpu.vector_store %arg11[%c0_25, %c0_26], %31 {strides = array<i32>} : memref<32x4xf32, #tpu.memory_space<vmem>>, vector<32x4xf32>,
    %33 = vector.extract_strided_slice %27 {offsets = [0, 4], sizes = [32, 4], strides = [1, 1]} : vector<32x8xf32> to vector<32x4xf32>
    %cst_27 = arith.constant 0.000000e+00 : f32
    %34 = vector.broadcast %cst_27 : f32 to vector<32x4xf32>
    %35 = arith.maximumf %33, %34 : vector<32x4xf32>
    %36 = vector.broadcast %cst_27 : f32 to vector<32x4xf32>
    %37 = arith.subf %33, %36 : vector<32x4xf32>
    %38 = arith.cmpf one, %37, %37 : vector<32x4xf32>
    %39 = vector.broadcast %cst_27 : f32 to vector<32x4xf32>
    %40 = arith.addf %33, %39 : vector<32x4xf32>
    %41 = math.absf %37 : vector<32x4xf32>
    %cst_28 = arith.constant 0.000000e+00 : f32
    %42 = vector.broadcast %cst_28 : f32 to vector<32x4xf32>
    %43 = arith.subf %42, %41 : vector<32x4xf32>
    %44 = math.exp %43 : vector<32x4xf32>
    %45 = math.log1p %44 : vector<32x4xf32>
    %46 = arith.addf %35, %45 : vector<32x4xf32>
    %47 = arith.select %38, %40, %46 : vector<32x4xi1>, vector<32x4xf32>
    %c0_29 = arith.constant 0 : index
    %c0_30 = arith.constant 0 : index
    %48 = vector.load %arg12[%c0_29, %c0_30] : memref<32x4xf32, #tpu.memory_space<vmem>>, vector<32x4xf32>
    tpu.vector_store %arg12[%c0_29, %c0_30], %47 {strides = array<i32>} : memref<32x4xf32, #tpu.memory_space<vmem>>, vector<32x4xf32>,
    return
  }
  func.func @transform_0(%arg0: i32) -> (i32, i32) {
    %c0_i32 = arith.constant 0 : i32
    %c0_i32_0 = arith.constant 0 : i32
    %c0_i32_1 = arith.constant 0 : i32
    return %c0_i32, %c0_i32_0 : i32, i32
  }
  func.func @transform_1(%arg0: i32) -> (i32, i32) {
    %c0_i32 = arith.constant 0 : i32
    %c0_i32_0 = arith.constant 0 : i32
    return %arg0, %c0_i32 : i32, i32
  }
  func.func @transform_2(%arg0: i32) -> (i32, i32) {
    %c0_i32 = arith.constant 0 : i32
    %c0_i32_0 = arith.constant 0 : i32
    %c0_i32_1 = arith.constant 0 : i32
    return %c0_i32, %c0_i32_0 : i32, i32
  }
  func.func @transform_3(%arg0: i32) -> (i32, i32) {
    %c0_i32 = arith.constant 0 : i32
    %c0_i32_0 = arith.constant 0 : i32
    %c0_i32_1 = arith.constant 0 : i32
    return %c0_i32, %c0_i32_0 : i32, i32
  }
  func.func @transform_4(%arg0: i32) -> (i32, i32) {
    %c0_i32 = arith.constant 0 : i32
    %c0_i32_0 = arith.constant 0 : i32
    %c0_i32_1 = arith.constant 0 : i32
    return %c0_i32, %c0_i32_0 : i32, i32
  }
  func.func @transform_5(%arg0: i32) -> (i32, i32) {
    %c0_i32 = arith.constant 0 : i32
    %c0_i32_0 = arith.constant 0 : i32
    %c0_i32_1 = arith.constant 0 : i32
    return %c0_i32, %c0_i32_0 : i32, i32
  }
  func.func @transform_6(%arg0: i32) -> (i32, i32) {
    %c0_i32 = arith.constant 0 : i32
    %c0_i32_0 = arith.constant 0 : i32
    %c0_i32_1 = arith.constant 0 : i32
    return %c0_i32, %c0_i32_0 : i32, i32
  }
  func.func @transform_7(%arg0: i32) -> (i32, i32) {
    %c0_i32 = arith.constant 0 : i32
    %c0_i32_0 = arith.constant 0 : i32
    %c0_i32_1 = arith.constant 0 : i32
    return %c0_i32, %c0_i32_0 : i32, i32
  }
  func.func @transform_8(%arg0: i32) -> (i32, i32) {
    %c0_i32 = arith.constant 0 : i32
    %c0_i32_0 = arith.constant 0 : i32
    %c0_i32_1 = arith.constant 0 : i32
    return %c0_i32, %c0_i32_0 : i32, i32
  }
  func.func @transform_9(%arg0: i32) -> (i32, i32) {
    %c0_i32 = arith.constant 0 : i32
    %c0_i32_0 = arith.constant 0 : i32
    %c0_i32_1 = arith.constant 0 : i32
    return %c0_i32, %c0_i32_0 : i32, i32
  }
  func.func @transform_10(%arg0: i32) -> (i32, i32) {
    %c0_i32 = arith.constant 0 : i32
    %c0_i32_0 = arith.constant 0 : i32
    return %arg0, %c0_i32 : i32, i32
  }
  func.func @transform_11(%arg0: i32) -> (i32, i32) {
    %c0_i32 = arith.constant 0 : i32
    %c0_i32_0 = arith.constant 0 : i32
    return %arg0, %c0_i32 : i32, i32
  }
}

</mosaic_0001>

<bundles_post_ra>
// kernel: tpu_custom_call.1
= control target key start
LH: loop header
LB: loop body
LE: loop exit
PB: predicated region body
PF: predicated region fallthrough
CT: control target
= control target key end

     0   :  { %s1304_s19 = smov 0   ;;  %s1432_s0 = inlined_call_operand.<no memory space> [shape: f32[1,1], index: 0, kind: input, shape index: {}]   ;;  %s1433_s1 = inlined_call_operand.vmem [shape: f32[64,8], index: 1, kind: input, shape index: {}]   ;;  %s1434_s2 = inlined_call_operand.vmem [shape: f32[8,64], index: 2, kind: input, shape index: {}]   ;;  %s1435_s3 = inlined_call_operand.vmem [shape: f32[1,64], index: 3, kind: input, shape index: {}]   ;;  %s1436_s4 = inlined_call_operand.vmem [shape: f32[64,32], index: 4, kind: input, shape index: {}]   ;;  %s1437_s5 = inlined_call_operand.vmem [shape: f32[1,32], index: 5, kind: input, shape index: {}]   ;;  %s1438_s6 = inlined_call_operand.vmem [shape: f32[32,16], index: 6, kind: input, shape index: {}]   ;;  %s1439_s7 = inlined_call_operand.vmem [shape: f32[1,16], index: 7, kind: input, shape index: {}]   ;;  %s1440_s8 = inlined_call_operand.vmem [shape: f32[16,8], index: 8, kind: input, shape index: {}]   ;;  %s1441_s9 = inlined_call_operand.vmem [shape: f32[1,8], index: 9, kind: input, shape index: {}]   ;;  %s1442_s10 = inlined_call_operand.vmem [shape: f32[64,4], index: 10, kind: output, shape index: {0}]   ;;  %s1443_s11 = inlined_call_operand.vmem [shape: f32[64,4], index: 11, kind: output, shape index: {1}]  }
   0x1   :  { %17 = sst [smem:[#allocation2]] %s1432_s0 }
   0x2 LB: > { %s1053_s20 = sadd.s32 4294967295, %s1238_s19   ;;  %p1057_p0 = scmp.ge.s32.totalorder %s1238_s19, 1  ;;  %s1238_s19 = sphi %s1304_s19, %s23_s19  }
   0x3   : > { %p342_p1 = scmp.lt.s32.totalorder %s1238_s19, 3 }
   0x5   : > { %p343_p2 = pnand %p1057_p0, %p342_p1 }
   0x6   : > { %v410_v0 = vld [vmem:[%s1434_s2] sm:$0xff] (!%p343_p2)  ;;  %s1058_s0 = sshll.u32 (!%p343_p2), %s1053_s20, 2  ;;  %v521_v2 = vld [vmem:[%s1436_s4 + $0x8] sm:$0xff] (!%p343_p2)  ;;  %v522_v4 = vld [vmem:[%s1436_s4 + $0x10] sm:$0xff] (!%p343_p2)  ;;  %vm418_vm0 = vcmask (!%p343_p2), 64512   ;;  %vm535_vm1 = vcmask (!%p343_p2), 523264  }
   0x7   : > { %346 = sbr.rel (%p343_p2) target bundleno = 1048 (0x418), region = 60  ;;  %v520_v1 = vld [vmem:[%s1436_s4] sm:$0xff] (!%p343_p2)  ;;  %1117 = vmatprep.subr.mxu0 (!%p343_p2), %v410_v0  ;;  %p388_p3 = scmp.lt.s32.totalorder (!%p343_p2), %s1058_s0, 7  ;;  %v523_v5 = vld [vmem:[%s1436_s4 + $0x18] sm:$0xff] (!%p343_p2)  ;;  %v525_v8 = vld [vmem:[%s1436_s4 + $0x28] sm:$0xff] (!%p343_p2)  ;;  %vm648_vm2 = vcmask (!%p343_p2), 261120  }
   0x8   : > { %v1171_v3 = vpack.c.bf16 (!%p343_p2), %v521_v2, %v520_v1  ;;  %1118 = vmatpush3.msra.mxu0 (!%p343_p2), %v410_v0  ;;  %v1175_v6 = vpack.c.bf16 (!%p343_p2), %v523_v5, %v522_v4  ;;  %v524_v7 = vld [vmem:[%s1436_s4 + $0x20] sm:$0xff] (!%p343_p2)  ;;  %v526_v14 = vld [vmem:[%s1436_s4 + $0x30] sm:$0xff] (!%p343_p2)  ;;  %v527_v15 = vld [vmem:[%s1436_s4 + $0x38] sm:$0xff] (!%p343_p2)  ;;  %vm759_vm3 = vcmask (!%p343_p2), 130048   ;;  %s405_s26 = sld [smem:[#allocation2]] (!%p343_p2)  ;;  %vm866_vm4 = vcmask (!%p343_p2), 31744  }
   0x9   : > { %v1179_v9 = vpack.c.bf16 (!%p343_p2), %v525_v8, %v524_v7  ;;  %v1183_v16 = vpack.c.bf16 (!%p343_p2), %v527_v15, %v526_v14  ;;  %v637_v17 = vld [vmem:[%s1438_s6] sm:$0xff] (!%p343_p2)  ;;  %v638_v18 = vld [vmem:[%s1438_s6 + $0x8] sm:$0xff] (!%p343_p2)  ;;  %v639_v33 = vld [vmem:[%s1438_s6 + $0x10] sm:$0xff] (!%p343_p2)  ;;  %s1240_s30 = smov (!%p343_p2), 124  }
   0xa   : > { %1172 = vmatprep.subr.bf16.mxu1 (!%p343_p2), %v1171_v3  ;;  %v1187_v19 = vpack.c.bf16 (!%p343_p2), %v638_v18, %v637_v17  ;;  %v1064_v20 = vld [vmem:[%s1435_s3] ss:$0 sm:$0xff] (!%p343_p2)  ;;  %v640_v34 = vld [vmem:[%s1438_s6 + $0x18] sm:$0xff] (!%p343_p2)  ;;  %v751_v37 = vld [vmem:[%s1440_s8 + $0x8] sm:$0xff] (!%p343_p2) }
   0xb   : > { %1174 = vmatpush3.bf16.msra.mxu1 (!%p343_p2), %v1171_v3  ;;  %v1191_v35 = vpack.c.bf16 (!%p343_p2), %v640_v34, %v639_v33  ;;  %v750_v36 = vld [vmem:[%s1440_s8] sm:$0xff] (!%p343_p2) }
   0xc   : > { %1176 = vmatprep.subr.bf16.mxu1 (!%p343_p2), %v1175_v6  ;;  %1188 = vmatprep.subr.bf16.mxu0 (!%p343_p2), %v1187_v19  ;;  %v1195_v38 = vpack.c.bf16 (!%p343_p2), %v751_v37, %v750_v36  ;;  %v1069_v39 = vld [vmem:[%s1437_s5] ss:$0 sm:$0xff] (!%p343_p2) }
   0xd   : > { %v1074_v52 = vld [vmem:[%s1439_s7] ss:$0 sm:$0xff] (!%p343_p2) }
   0xe   : > { %s1447_s0 = smov (!%p388_p3, %s1058_s0), 7  ;;  %v1079_v1 = vld [vmem:[%s1441_s9] ss:$0 sm:$0xff] }
   0xf   : > { %s1333_s16 = sshll.u32 %s1447_s0, 3  ;;  %1178 = vmatpush3.bf16.msra.mxu1 %v1175_v6 }
  0x10   : > { %s391_s20 = scalar_lea.vmem %s1433_s1, %s1333_s16  ;;  %1180 = vmatprep.subr.bf16.mxu1 %v1179_v9  ;;  %s397_s29 = scalar_lea.vmem %s1442_s10, %s1333_s16 }
  0x11   : > { %v406_v10 = vld [vmem:[%s391_s20] sm:$0xff]  ;;  %v407_v11 = vld [vmem:[%s391_s20 + $0x8] sm:$0xff]  ;;  %v408_v12 = vld [vmem:[%s391_s20 + $0x10] sm:$0xff]  ;;  %s403_s14 = scalar_lea.vmem %s1443_s11, %s1333_s16 }
  0x12   : > { %1119 = vmatprep.mubr.msk.f32.mxu0 %vm418_vm0, %v406_v10  ;;  %v409_v13 = vld [vmem:[%s391_s20 + $0x18] sm:$0xff] }
  0x13   : > { %1120 = vmatmul.mubr.msk.f32.vlgmr.msra.gmra.mrb[0].mxu0 %vm418_vm0, %v407_v11  ;;  %1182 = vmatpush3.bf16.msra.mxu1 %v1179_v9 }
  0x14   : > { %1122 = vmatprep.mubr.msk.f32.mxu0 %vm418_vm0, %v408_v12  ;;  %1184 = vmatprep.subr.bf16.mxu1 %v1183_v16 }
  0x15   : > { %1190 = vmatpush3.bf16.msra.mxu0 %v1187_v19 }
  0x16   : > { %1192 = vmatprep.subr.bf16.mxu0 %v1191_v35 }
  0x17   : > { %1123 = vmatmul.mubr.msk.f32.gmra.mrb[2].mxu0 %vm418_vm0, %v409_v13  ;;  %1186 = vmatpush3.bf16.msra.mxu1 %v1183_v16 }
  0x19   : > { %1194 = vmatpush3.bf16.msra.mxu0 %v1191_v35 }
  0x1a   : > { %1196 = vmatprep.subr.bf16.mxu0 %v1195_v38 }
  0xe6   : > { %v1121_v21 = vpop.f32.mrb[0].mxu0 }
  0xe7   : > { %v503_v22 = vadd.f32 %v1121_v21, %v1064_v20  ;;  %v497_v23 = vpop.f32.mrb[1].mxu0  ;;  %v861_v21 = vstv %s405_s26 }
  0xe8   : > { %v498_v24 = vadd.f32 %v1064_v20, %v497_v23 }
  0xe9   : > { %v517_v27 = vmax.f32 %v503_v22, 0.0 }
  0xea   : > { %v516_v25 = vmax.f32 %v498_v24, 0.0  ;;  %v1124_v26 = vpop.f32.mrb[2].mxu0 }
  0xeb   : > { %v513_v28 = vadd.f32 %v1124_v26, %v1064_v20  ;;  %v507_v29 = vpop.f32.mrb[3].mxu0 }
  0xec   : > { %v508_v30 = vadd.f32 %v1064_v20, %v507_v29  ;;  %1141 = vmatprep.mubr.msk.f32.mxu1 %vm535_vm1, %v516_v25 }
  0xed   : > { %1142 = vmatmul.mubr.msk.f32.vlgmr.msra.gmra.mrb[0].mxu1 %vm535_vm1, %v517_v27  ;;  %v519_v32 = vmax.f32 %v513_v28, 0.0 }
  0xee   : > { %v518_v31 = vmax.f32 %v508_v30, 0.0 }
  0xf0   : > { %1144 = vmatprep.mubr.msk.f32.mxu1 %vm535_vm1, %v518_v31 }
  0xf1   : > { %1145 = vmatmul.mubr.msk.f32.gmra.mrb[2].mxu1 %vm535_vm1, %v519_v32 }
 0x1c0   : > { %v1143_v40 = vpop.f32.mrb[0].mxu1 }
 0x1c1   : > { %v620_v41 = vadd.f32 %v1143_v40, %v1069_v39  ;;  %v614_v42 = vpop.f32.mrb[1].mxu1 }
 0x1c2   : > { %v615_v43 = vadd.f32 %v1069_v39, %v614_v42 }
 0x1c3   : > { %v634_v46 = vmax.f32 %v620_v41, 0.0 }
 0x1c4   : > { %v633_v44 = vmax.f32 %v615_v43, 0.0  ;;  %v1146_v45 = vpop.f32.mrb[2].mxu1 }
 0x1c5   : > { %v630_v47 = vadd.f32 %v1146_v45, %v1069_v39  ;;  %v624_v48 = vpop.f32.mrb[3].mxu1 }
 0x1c6   : > { %v625_v49 = vadd.f32 %v1069_v39, %v624_v48  ;;  %1155 = vmatprep.mubr.msk.f32.mxu0 %vm648_vm2, %v633_v44 }
 0x1c7   : > { %1156 = vmatmul.mubr.msk.f32.vlgmr.msra.gmra.mrb[4].mxu0 %vm648_vm2, %v634_v46  ;;  %v636_v51 = vmax.f32 %v630_v47, 0.0 }
 0x1c8   : > { %v635_v50 = vmax.f32 %v625_v49, 0.0  ;;  %1198 = vmatpush3.bf16.msra.mxu0 %v1195_v38 }
 0x1ca   : > { %1158 = vmatprep.mubr.msk.f32.mxu0 %vm648_vm2, %v635_v50 }
 0x1cb   : > { %1159 = vmatmul.mubr.msk.f32.gmra.mrb[6].mxu0 %vm648_vm2, %v636_v51 }
 0x29a   : > { %v1157_v53 = vpop.f32.mrb[4].mxu0 }
 0x29b   : > { %v733_v54 = vadd.f32 %v1157_v53, %v1074_v52  ;;  %v727_v55 = vpop.f32.mrb[5].mxu0 }
 0x29c   : > { %v728_v56 = vadd.f32 %v1074_v52, %v727_v55 }
 0x29d   : > { %v747_v59 = vmax.f32 %v733_v54, 0.0 }
 0x29e   : > { %v746_v57 = vmax.f32 %v728_v56, 0.0  ;;  %v1160_v58 = vpop.f32.mrb[6].mxu0 }
 0x29f   : > { %v743_v60 = vadd.f32 %v1160_v58, %v1074_v52  ;;  %v737_v61 = vpop.f32.mrb[7].mxu0 }
 0x2a0   : > { %v738_v62 = vadd.f32 %v1074_v52, %v737_v61  ;;  %1165 = vmatprep.mubr.msk.f32.mxu0 %vm759_vm3, %v746_v57 }
 0x2a1   : > { %1166 = vmatmul.mubr.msk.f32.vlgmr.msra.gmra.mrb[8].mxu0 %vm759_vm3, %v747_v59  ;;  %v749_v0 = vmax.f32 %v743_v60, 0.0 }
 0x2a2   : > { %v748_v63 = vmax.f32 %v738_v62, 0.0 }
 0x2a4   : > { %1168 = vmatprep.mubr.msk.f32.mxu0 %vm759_vm3, %v748_v63 }
 0x2a5   : > { %1169 = vmatmul.mubr.msk.f32.gmra.mrb[10].mxu0 %vm759_vm3, %v749_v0 }
 0x374   : > { %v1167_v2 = vpop.f32.mrb[8].mxu0 }
 0x375   : > { %v1375_v3 = vadd.f32 %v1167_v2, %v1079_v1  ;;  %v838_v4 = vpop.f32.mrb[9].mxu0 }
 0x376   : > { %v1377_v5 = vadd.f32 %v1079_v1, %v838_v4 }
 0x377   : > { %1208 = vtanh.f32 %v1375_v3  ;;  %v884_v6 = vand.u32 2147483647, %v1375_v3  ;;  %v872_v0 = vmax.f32 %v1375_v3, 0.0  ;;  %vm876_vm11 = vcmp.ne.f32.partialorder %v1375_v3, %v1375_v3 }
 0x378   : > { %1210 = vtanh.f32 %v1377_v5  ;;  %v883_v7 = vand.u32 2147483647, %v1377_v5  ;;  %v1170_v8 = vpop.f32.mrb[10].mxu0  ;;  %v871_v49 = vmax.f32 %v1377_v5, 0.0  ;;  %vm875_vm7 = vcmp.ne.f32.partialorder %v1377_v5, %v1377_v5 }
 0x379   : > { %v888_v9 = vsub.f32 0.0, %v884_v6  ;;  %v1383_v10 = vadd.f32 %v1170_v8, %v1079_v1  ;;  %v848_v11 = vpop.f32.mrb[11].mxu0 }
 0x37a   : > { %v887_v12 = vsub.f32 0.0, %v883_v7  ;;  %v1385_v13 = vadd.f32 %v1079_v1, %v848_v11 }
 0x37b   : > { %v893_v14 = vmul.f32 1.442695, %v888_v9  ;;  %1212 = vtanh.f32 %v1383_v10  ;;  %v886_v15 = vand.u32 2147483647, %v1383_v10  ;;  %vm878_vm12 = vcmp.ne.f32.partialorder %v1383_v10, %v1383_v10 }
 0x37c   : > { %v891_v16 = vmul.f32 1.442695, %v887_v12  ;;  %1214 = vtanh.f32 %v1385_v13  ;;  %v885_v17 = vand.u32 2147483647, %v1385_v13  ;;  %v873_v2 = vmax.f32 %v1385_v13, 0.0 }
 0x37d   : > { %1216 = vpow2.f32 %v893_v14  ;;  %v890_v18 = vsub.f32 0.0, %v886_v15  ;;  %v874_v15 = vmax.f32 %v1383_v10, 0.0  ;;  %vm877_vm10 = vcmp.ne.f32.partialorder %v1385_v13, %v1385_v13 }
 0x37e   : > { %1218 = vpow2.f32 %v891_v16  ;;  %v889_v19 = vsub.f32 0.0, %v885_v17 }
 0x37f   : > { %v897_v20 = vmul.f32 1.442695, %v890_v18 }
 0x380   : > { %v895_v22 = vmul.f32 1.442695, %v889_v19 }
 0x381   : > { %v1209_v23 = vpop.eup %1208  ;;  %1220 = vpow2.f32 %v897_v20 }
 0x382   : > { %v1211_v24 = vpop.eup %1210  ;;  %1222 = vpow2.f32 %v895_v22  ;;  %v863_v26 = vmul.f32 %v1209_v23, %v861_v21 }
 0x383   : > { %v862_v25 = vmul.f32 %v1211_v24, %v861_v21 }
 0x384   : > { %868 = vst.msk [vmem:[%s397_s29 + $0x8] sm:$0xff] %vm866_vm4, %v863_v26 }
 0x385   : > { %v1213_v27 = vpop.eup %1212  ;;  %867 = vst.msk [vmem:[%s397_s29] sm:$0xff] %vm866_vm4, %v862_v25 }
 0x386   : > { %v1215_v28 = vpop.eup %1214  ;;  %v865_v32 = vmul.f32 %v1213_v27, %v861_v21 }
 0x387   : > { %v1217_v29 = vpop.eup %1216  ;;  %v864_v30 = vmul.f32 %v1215_v28, %v861_v21 }
 0x388   : > { %v1219_v31 = vpop.eup %1218  ;;  %v908_v33 = vadd.f32 1.0, %v1217_v29  ;;  %870 = vst.msk [vmem:[%s397_s29 + $0x18] sm:$0xff] %vm866_vm4, %v865_v32  ;;  %v911_v39 = vmul.f32 -0.5, %v1217_v29  ;;  %v914_v42 = vand.u32 2147483647, %v1217_v29 }
 0x389   : > { %v899_v34 = vadd.f32 1.0, %v1219_v31  ;;  %869 = vst.msk [vmem:[%s397_s29 + $0x10] sm:$0xff] %vm866_vm4, %v864_v30  ;;  %v902_v40 = vmul.f32 -0.5, %v1219_v31  ;;  %v905_v46 = vand.u32 2147483647, %v1219_v31 }
 0x38a   : > { %1224 = vlog2.f32 %v908_v33  ;;  %v912_v41 = vadd.f32 1.0, %v911_v39  ;;  %vm1400_vm5 = vcmp.lt.f32.partialorder %v914_v42, 0.0004427343 }
 0x38b   : > { %v1221_v35 = vpop.eup %1220  ;;  %1226 = vlog2.f32 %v899_v34  ;;  %v903_v43 = vadd.f32 1.0, %v902_v40  ;;  %vm906_vm6 = vcmp.lt.f32.partialorder %v905_v46, 0.0004427343 }
 0x38c   : > { %v1223_v36 = vpop.eup %1222  ;;  %v926_v37 = vadd.f32 1.0, %v1221_v35  ;;  %v929_v45 = vmul.f32 -0.5, %v1221_v35  ;;  %v913_v51 = vmul.f32 %v1217_v29, %v912_v41  ;;  %v932_v58 = vand.u32 2147483647, %v1221_v35 }
 0x38d   : > { %v917_v38 = vadd.f32 1.0, %v1223_v36  ;;  %v920_v44 = vmul.f32 -0.5, %v1223_v36  ;;  %v904_v54 = vmul.f32 %v1219_v31, %v903_v43  ;;  %v923_v57 = vand.u32 2147483647, %v1223_v36 }
 0x38e   : > { %1228 = vlog2.f32 %v926_v37  ;;  %v930_v56 = vadd.f32 1.0, %v929_v45  ;;  %vm933_vm9 = vcmp.lt.f32.partialorder %v932_v58, 0.0004427343 }
 0x38f   : > { %1230 = vlog2.f32 %v917_v38  ;;  %v921_v55 = vadd.f32 1.0, %v920_v44  ;;  %vm924_vm8 = vcmp.lt.f32.partialorder %v923_v57, 0.0004427343 }
 0x390   : > { %v931_v7 = vmul.f32 %v1221_v35, %v930_v56 }
 0x391   : > { %v922_v6 = vmul.f32 %v1223_v36, %v921_v55 }
 0x394   : > { %v1225_v47 = vpop.eup %1224 }
 0x395   : > { %v1227_v48 = vpop.eup %1226  ;;  %v910_v50 = vmul.f32 0.6931472, %v1225_v47 }
 0x396   : > { %v901_v53 = vmul.f32 0.6931472, %v1227_v48 }
 0x397   : > { %v916_v61 = vsel %vm1400_vm5, %v913_v51, %v910_v50 }
 0x398   : > { %v1229_v59 = vpop.eup %1228  ;;  %v907_v60 = vsel %vm906_vm6, %v904_v54, %v901_v53  ;;  %v936_v9 = vadd.f32 %v916_v61, %v872_v0 }
 0x399   : > { %v1231_v62 = vpop.eup %1230  ;;  %v935_v63 = vadd.f32 %v907_v60, %v871_v49  ;;  %v928_v1 = vmul.f32 0.6931472, %v1229_v59 }
 0x39a   : > { %v919_v4 = vmul.f32 0.6931472, %v1231_v62 }
 0x39b   : > { %v939_v8 = vsel %vm875_vm7, %v1377_v5, %v935_v63  ;;  %v934_v12 = vsel %vm933_vm9, %v931_v7, %v928_v1  ;;  %v940_v5 = vsel %vm876_vm11, %v1375_v3, %v936_v9 }
 0x39c   : > { %947 = vrot.lane.b32.xlu0 %v939_v8, %s1240_s30  ;;  %v925_v11 = vsel %vm924_vm8, %v922_v6, %v919_v4  ;;  %v938_v17 = vadd.f32 %v934_v12, %v874_v15 }
 0x39d   : > { %v937_v14 = vadd.f32 %v925_v11, %v873_v2 }
 0x39e   : > { %v942_v18 = vsel %vm878_vm12, %v1383_v10, %v938_v17 }
 0x39f   : > { %v941_v16 = vsel %vm877_vm10, %v1385_v13, %v937_v14 }
 0x3a0   : > { %951 = vrot.lane.b32.xlu1 %v941_v16, %s1240_s30  ;;  %949 = vrot.lane.b32.xlu0 %v940_v5, %s1240_s30 }
 0x3a4   : > { %953 = vrot.lane.b32.xlu1 %v942_v18, %s1240_s30 }
 0x40e   : > { %v948_v19 = vpop.permute.xlu0 %947 }
 0x40f   : > { %959 = vst.msk [vmem:[%s403_s14] sm:$0xff] %vm866_vm4, %v948_v19 }
 0x412   : > { %v952_v20 = vpop.permute.xlu1 %951  ;;  %v950_v13 = vpop.permute.xlu0 %949 }
 0x413   : > { %960 = vst.msk [vmem:[%s403_s14 + $0x8] sm:$0xff] %vm866_vm4, %v950_v13  ;;  %961 = vst.msk [vmem:[%s403_s14 + $0x10] sm:$0xff] %vm866_vm4, %v952_v20 }
 0x416   : > { %v954_v3 = vpop.permute.xlu1 %953 }
 0x417   : > { %962 = vst.msk [vmem:[%s403_s14 + $0x18] sm:$0xff] %vm866_vm4, %v954_v3 }
 0x418 PF: > { %s23_s19 = sadd.s32 1, %s1238_s19  }
 0x419   : > { %p20_p4 = scmp.ge.s32.totalorder %s23_s19, 4  }
 0x41b   :  { %22 = sbr.rel (!%p20_p4) target bundleno = 2 (0x2), region = 102 }

</bundles_post_ra>
